<compile_context>
chip_gen: v5e
topology: v5e:2x2
jax: 0.10.0
libtpu: 0.0.40
codegen_flags: <defaults>
</compile_context>

<pallas_src>
import jax
import jax.numpy as jnp
from jax import lax
from jax.experimental import pallas as pl
from jax.experimental.pallas import tpu as pltpu


def _exact_gelu(x):
    # PyTorch nn.GELU() default (approximate='none'): 0.5*x*(1+erf(x/sqrt(2)))
    return 0.5 * x * (1.0 + lax.erf(x / jnp.sqrt(2.0).astype(x.dtype)))


# ----------------------------- kernels ---------------------------------------

def _make_spatial_kernel(use_mxu):
    def kernel(attn_ref, conv_ref, wsg_ref, out_ref):
        attn = attn_ref[...]                          # (TL, C) native dtype
        conv = conv_ref[...]
        if use_mxu:
            # 1x1 Conv2d(C -> 1): N=1 MXU matmul with f32 accumulation.  The MXU
            # slot is otherwise idle in this kernel so the push cost is ~free,
            # and it avoids both a full-tile f32 upcast (v5e has no bf16 VALU)
            # and the XLU lane-reduce tree (binding-slot risk at v7x HBM BW).
            logits = jnp.dot(attn, wsg_ref[...],
                             preferred_element_type=jnp.float32)      # (TL, 1)
        else:
            # f32 inputs: native-dtype VPU multiply + f32 cross-lane reduce
            # (no upcast copy is created; bit-exact vs the f32 reference).
            logits = jnp.sum(attn * wsg_ref[...], axis=-1, keepdims=True)
        # NOTE: jax.nn.sigmoid lowers to the EUP path; logits are (TL, 1) so the
        # transcendental work is one lane-sparse vreg column per 8 rows — small
        # next to the per-tile DMA time even at v7x bandwidth.
        sm = jax.nn.sigmoid(logits).astype(attn.dtype)                 # (TL, 1)
        out_ref[...] = (attn + conv * sm).astype(out_ref.dtype)
    return kernel


def _channel_mod_kernel(attn_ref, conv_ref, cm_ref, out_ref):
    # attn/conv/out: (TL, C) tile; cm: (1, C) per-batch modulation (precomputed)
    cm = cm_ref[...]                                                   # (1, C)
    out_ref[...] = (attn_ref[...] * cm + conv_ref[...]).astype(out_ref.dtype)


# ----------------------------- sizing helpers ---------------------------------

def _vmem_limit_bytes():
    """Generation-aware scoped-VMEM limit: ~64 MiB on 128-MiB-VMEM chips
    (v5e/v6e), ~44 MiB on 64-MiB-VMEM chips (v7x); conservative 48 MiB fallback
    if the hardware query is unavailable."""
    cap = None
    try:
        cap = getattr(pltpu.get_tpu_info(), "vmem_capacity_bytes", None)
    except Exception:
        cap = None
    if not cap:
        return 48 * 1024 * 1024
    return min(64 * 1024 * 1024, max(32 * 1024 * 1024, int(cap * 0.7)))


def _pick_tile_l(L, C, itemsize, vmem_limit, B, min_programs=4):
    """Largest L-tile (multiple of the sublane pack) whose pipelined footprint
    (2 inputs + 1 output, double-buffered) stays under the scoped-VMEM limit.
    Prefers a tile that divides L exactly (no ragged/masked tail block) and
    guarantees >= min_programs grid steps so dual-TC (v7x) / megacore sharding
    always has work on every core."""
    sub = max(8, 32 // itemsize)                 # f32 -> 8, bf16 -> 16, int8 -> 32
    # Headroom for the small (1,C)/(C,1) operands and compiler-internal scratch.
    budget = max(4 * 1024 * 1024, vmem_limit - 8 * 1024 * 1024)
    tl = budget // (6 * C * itemsize)            # 3 arrays x 2 pipeline buffers
    tl = min(tl, 8192, L)
    tl = max(sub, (tl // sub) * sub)
    if tl >= L:
        tl = L
    # Guarantee enough grid programs for cross-core sharding.
    if B * (-(-L // tl)) < min_programs and L > sub:
        want_nl = -(-min_programs // max(B, 1))
        tl2 = -(-(-(-L // want_nl)) // sub) * sub      # ceil(L/want_nl) -> ceil to sub
        tl = max(sub, min(tl, tl2))
    # Prefer a tile that divides L exactly (avoid a ragged, masked tail block).
    if tl < L and L % tl != 0:
        d = (tl // sub) * sub
        while d >= sub:
            if L % d == 0:
                tl = d
                break
            d -= sub
    return max(1, min(tl, L))


# ----------------------------- wrapper ----------------------------------------

def simplified_aim(attn_feat, conv_feat, interaction_type, H, W, params, *,
                   tile_l=None):
    """Pallas implementation of SimplifiedAIM.forward.

    attn_feat, conv_feat: (B, L, C) with L == H * W.
    params:
      'w_sg': (1, C, 1, 1)   sg 1x1 conv weight
      'w1'  : (Cr, C, 1, 1)  cg first 1x1 conv weight
      'w2'  : (C, Cr, 1, 1)  cg second 1x1 conv weight
    """
    B, L, C = attn_feat.shape
    assert L == H * W
    dtype = attn_feat.dtype
    itemsize = jnp.dtype(dtype).itemsize
    vmem_limit = _vmem_limit_bytes()

    cparams = pltpu.CompilerParams(
        dimension_semantics=("parallel", "parallel"),
        vmem_limit_bytes=vmem_limit,
    )

    if interaction_type == 'spatial_modulates_channel':
        # TODO(synk): for production shapes where C is not a multiple of 128,
        # pad C to the next lane multiple on the wrapper side so output stores
        # are unmasked; the small-C demo config exercises the masked-store path.
        tl = (min(tile_l, L) if tile_l is not None
              else _pick_tile_l(L, C, itemsize, vmem_limit, B))
        n_l = pl.cdiv(L, tl)
        feat_spec = pl.BlockSpec((pl.Squeezed(), tl, C), lambda b, l: (b, l, 0))
        use_mxu = dtype != jnp.float32          # bf16/f16 -> MXU dot, f32 acc
        if use_mxu:
            wsg = params['w_sg'].reshape(C, 1).astype(dtype)           # (C, 1)
            wsg_spec = pl.BlockSpec((C, 1), lambda b, l: (0, 0))
        else:
            wsg = params['w_sg'].reshape(1, C).astype(jnp.float32)     # (1, C)
            wsg_spec = pl.BlockSpec((1, C), lambda b, l: (0, 0))
        cost = pl.CostEstimate(
            flops=4 * B * L * C,
            transcendentals=B * L,
            bytes_accessed=3 * B * L * C * itemsize + C * itemsize,
        )
        return pl.pallas_call(
            _make_spatial_kernel(use_mxu),
            out_shape=jax.ShapeDtypeStruct((B, L, C), dtype),
            grid=(B, n_l),
            in_specs=[feat_spec, feat_spec, wsg_spec],
            out_specs=feat_spec,
            compiler_params=cparams,
            cost_estimate=cost,
        )(attn_feat, conv_feat, wsg)

    # ---- channel_modulates_spatial ------------------------------------------
    Cr = params['w1'].shape[0]
    w1t = params['w1'].reshape(Cr, C).T.astype(jnp.float32)            # (C, Cr)
    w2t = params['w2'].reshape(C, Cr).T.astype(jnp.float32)            # (Cr, C)

    # Stage 1 (tiny, hoisted out of the hot loop): global-avg-pool + SE-MLP for
    # all B at once, so the per-batch M=1 matmuls never hit the Pallas loop.
    # TODO(synk): conv_feat is read once here and again in Stage 2 (4 HBM passes
    # vs the 3 minimum); fusing the pool into conv_feat's producer removes it.
    pooled = jnp.mean(conv_feat.astype(jnp.float32), axis=1)           # (B, C)
    h = _exact_gelu(pooled @ w1t)                                      # (B, Cr)
    cm = jax.nn.sigmoid(h @ w2t).astype(dtype)                         # (B, C)
    cm3 = cm.reshape(B, 1, C)

    # Lane folding (layout plumbing only): for small C that divides 128, fold
    # g = 128 // C tokens per vreg row so output stores are lane-dense.
    a2, c2, L2, C2 = attn_feat, conv_feat, L, C
    if C < 128 and 128 % C == 0 and L % (128 // C) == 0:
        g = 128 // C
        L2, C2 = L // g, 128
        a2 = attn_feat.reshape(B, L2, C2)
        c2 = conv_feat.reshape(B, L2, C2)
        cm3 = jnp.tile(cm3, (1, 1, g))                                 # (B,1,128)

    if tile_l is None or L2 != L:
        tl = _pick_tile_l(L2, C2, itemsize, vmem_limit, B)
    else:
        tl = min(tile_l, L2)
    n_l = pl.cdiv(L2, tl)
    feat_spec = pl.BlockSpec((pl.Squeezed(), tl, C2), lambda b, l: (b, l, 0))
    cm_spec = pl.BlockSpec((pl.Squeezed(), 1, C2), lambda b, l: (b, 0, 0))
    cost = pl.CostEstimate(
        flops=2 * B * L * C,
        transcendentals=0,
        bytes_accessed=3 * B * L * C * itemsize + B * C * itemsize,
    )
    out = pl.pallas_call(
        _channel_mod_kernel,
        out_shape=jax.ShapeDtypeStruct((B, L2, C2), dtype),
        grid=(B, n_l),
        in_specs=[feat_spec, feat_spec, cm_spec],
        out_specs=feat_spec,
        compiler_params=cparams,
        cost_estimate=cost,
    )(a2, c2, cm3)
    return out.reshape(B, L, C)


# ----------------------------- pure-JAX reference -----------------------------

def simplified_aim_ref(attn_feat, conv_feat, interaction_type, H, W, params):
    B, L, C = attn_feat.shape
    if interaction_type == 'spatial_modulates_channel':
        w = params['w_sg'].reshape(1, 1, C)
        sm = jax.nn.sigmoid(jnp.sum(attn_feat * w, axis=-1, keepdims=True))
        return attn_feat + conv_feat * sm
    Cr = params['w1'].shape[0]
    w1 = params['w1'].reshape(Cr, C)
    w2 = params['w2'].reshape(C, Cr)
    pooled = jnp.mean(conv_feat, axis=1)                               # (B, C)
    h = _exact_gelu(pooled @ w1.T)                                     # (B, Cr)
    cm = jax.nn.sigmoid(h @ w2.T)                                      # (B, C)
    return attn_feat * cm[:, None, :] + conv_feat


# ----------------------------- main --------------------------------------------

if __name__ == "__main__":
    key = jax.random.PRNGKey(0)
    ok = True

    configs = [
        # (B, C, H, W, reduction_ratio, dtype, tile_l, atol, rtol)
        (2, 128, 16, 16, 8, jnp.float32, 128,  1e-5, 1e-5),  # lane-dense, 2 L-tiles
        (2, 32,  8,  8,  8, jnp.float32, None, 1e-5, 1e-5),  # small C (lane-folded channel path)
        (1, 128, 12, 20, 8, jnp.float32, None, 1e-5, 1e-5),  # auto tile, >=4 programs, divisor tile
        (1, 128, 12, 20, 8, jnp.float32, 64,   1e-5, 1e-5),  # ragged last block (240 = 3*64 + 48)
        (2, 128, 16, 16, 8, jnp.bfloat16, None, 1e-1, 1e-1), # bf16 -> MXU spatial path
    ]
    for (B, C, H, W, rr, dtype, tile_l, atol, rtol) in configs:
        Cr = max(C // rr, 1)
        L = H * W
        key, k_attn, k_conv, k_sg, k_w1, k_w2 = jax.random.split(key, 6)

        attn_feat = jax.random.normal(k_attn, (B, L, C), dtype=jnp.float32).astype(dtype)
        conv_feat = jax.random.normal(k_conv, (B, L, C), dtype=jnp.float32).astype(dtype)

        # Deterministic synthetic weights with PyTorch Conv2d weight shapes.
        params = {
            'w_sg': 0.1 * jax.random.normal(k_sg, (1, C, 1, 1), dtype=jnp.float32),
            'w1':   0.1 * jax.random.normal(k_w1, (Cr, C, 1, 1), dtype=jnp.float32),
            'w2':   0.1 * jax.random.normal(k_w2, (C, Cr, 1, 1), dtype=jnp.float32),
        }

        for itype in ('spatial_modulates_channel', 'channel_modulates_spatial'):
            out = simplified_aim(attn_feat, conv_feat, itype, H, W, params,
                                 tile_l=tile_l)
            out = jax.block_until_ready(out)
            ref = simplified_aim_ref(attn_feat.astype(jnp.float32),
                                     conv_feat.astype(jnp.float32),
                                     itype, H, W, params)
            if not jnp.allclose(out.astype(jnp.float32), ref, atol=atol, rtol=rtol):
                ok = False

    if ok:
        print("KERNEL_OK")
    else:
        raise SystemExit("mismatch vs reference")
</pallas_src>

<mosaic_0001>
module attributes {stable_mosaic.version = 11 : i64} {
  func.func @kernel(%arg0: i32, %arg1: i32, %arg2: memref<1x128x128xf32, #tpu.memory_space<vmem>>, %arg3: memref<1x128x128xf32, #tpu.memory_space<vmem>>, %arg4: memref<1x128xf32, #tpu.memory_space<vmem>>, %arg5: memref<1x128x128xf32, #tpu.memory_space<vmem>>) attributes {dimension_semantics = [#tpu.dimension_semantics<parallel>, #tpu.dimension_semantics<parallel>], iteration_bounds = array<i64: 2, 2>, scalar_prefetch = 0 : i64, scratch_operands = 0 : i64, tpu.core_type = #tpu.core_type<tc>, window_params = [{transform_indices = @transform_0, window_bounds = array<i64: 1, 128, 128>}, {transform_indices = @transform_1, window_bounds = array<i64: 1, 128, 128>}, {pipeline_mode = #tpu.pipeline_mode<synchronous>, transform_indices = @transform_2, window_bounds = array<i64: 1, 128>}, {transform_indices = @transform_3, window_bounds = array<i64: 1, 128, 128>}]} {
    %c0 = arith.constant 0 : index
    %c0_0 = arith.constant 0 : index
    %c0_1 = arith.constant 0 : index
    %0 = vector.load %arg2[%c0, %c0_0, %c0_1] : memref<1x128x128xf32, #tpu.memory_space<vmem>>, vector<1x128x128xf32>
    %1 = vector.shape_cast %0 : vector<1x128x128xf32> to vector<128x128xf32>
    %c0_2 = arith.constant 0 : index
    %c0_3 = arith.constant 0 : index
    %c0_4 = arith.constant 0 : index
    %2 = vector.load %arg3[%c0_2, %c0_3, %c0_4] : memref<1x128x128xf32, #tpu.memory_space<vmem>>, vector<1x128x128xf32>
    %3 = vector.shape_cast %2 : vector<1x128x128xf32> to vector<128x128xf32>
    %c0_5 = arith.constant 0 : index
    %c0_6 = arith.constant 0 : index
    %4 = vector.load %arg4[%c0_5, %c0_6] : memref<1x128xf32, #tpu.memory_space<vmem>>, vector<1x128xf32>
    %5 = vector.broadcast %4 : vector<1x128xf32> to vector<128x128xf32>
    %6 = arith.mulf %1, %5 : vector<128x128xf32>
    %cst = arith.constant dense<0.000000e+00> : vector<128xf32>
    %7 = vector.multi_reduction <add>, %6, %cst [1] : vector<128x128xf32> to vector<128xf32>
    %8 = vector.shape_cast %7 : vector<128xf32> to vector<128x1xf32>
    %9 = arith.negf %8 : vector<128x1xf32>
    %10 = math.exp %9 : vector<128x1xf32>
    %cst_7 = arith.constant 1.000000e+00 : f32
    %11 = vector.broadcast %cst_7 : f32 to vector<128x1xf32>
    %12 = arith.addf %11, %10 : vector<128x1xf32>
    %13 = arith.divf %11, %12 : vector<128x1xf32>
    %14 = vector.broadcast %13 : vector<128x1xf32> to vector<128x128xf32>
    %15 = arith.mulf %3, %14 : vector<128x128xf32>
    %16 = arith.addf %1, %15 : vector<128x128xf32>
    %c0_8 = arith.constant 0 : index
    %c0_9 = arith.constant 0 : index
    %c0_10 = arith.constant 0 : index
    %17 = vector.load %arg5[%c0_8, %c0_9, %c0_10] : memref<1x128x128xf32, #tpu.memory_space<vmem>>, vector<1x128x128xf32>
    %18 = vector.shape_cast %17 : vector<1x128x128xf32> to vector<128x128xf32>
    %19 = vector.shape_cast %16 : vector<128x128xf32> to vector<1x128x128xf32>
    tpu.vector_store %arg5[%c0_8, %c0_9, %c0_10], %19 {strides = array<i32>} : memref<1x128x128xf32, #tpu.memory_space<vmem>>, vector<1x128x128xf32>,
    return
  }
  func.func @transform_0(%arg0: i32, %arg1: i32) -> (i32, i32, i32) {
    %c0_i32 = arith.constant 0 : i32
    %c0_i32_0 = arith.constant 0 : i32
    return %arg0, %arg1, %c0_i32 : i32, i32, i32
  }
  func.func @transform_1(%arg0: i32, %arg1: i32) -> (i32, i32, i32) {
    %c0_i32 = arith.constant 0 : i32
    %c0_i32_0 = arith.constant 0 : i32
    return %arg0, %arg1, %c0_i32 : i32, i32, i32
  }
  func.func @transform_2(%arg0: i32, %arg1: i32) -> (i32, i32) {
    %c0_i32 = arith.constant 0 : i32
    %c0_i32_0 = arith.constant 0 : i32
    %c0_i32_1 = arith.constant 0 : i32
    return %c0_i32, %c0_i32_0 : i32, i32
  }
  func.func @transform_3(%arg0: i32, %arg1: i32) -> (i32, i32, i32) {
    %c0_i32 = arith.constant 0 : i32
    %c0_i32_0 = arith.constant 0 : i32
    return %arg0, %arg1, %c0_i32 : i32, i32, i32
  }
}

</mosaic_0001>

<bundles_post_ra>
// kernel: tpu_custom_call.1
= control target key start
LH: loop header
LB: loop body
LE: loop exit
PB: predicated region body
PF: predicated region fallthrough
CT: control target
= control target key end

     0   :  { %s1713_s0 = inlined_call_operand.hbm [shape: f32[2,256,128], index: 0, kind: input, shape index: {}]   ;;  %s1714_s1 = inlined_call_operand.hbm [shape: f32[2,256,128], index: 1, kind: input, shape index: {}]   ;;  %s1715_s2 = inlined_call_operand.vmem [shape: f32[1,128], index: 2, kind: input, shape index: {}]   ;;  %s1716_s3 = inlined_call_operand.hbm [shape: f32[2,256,128], index: 3, kind: output, shape index: {}]  }
   0x1   :  { %1720 = sst [smem:[#allocation14_spill]] %s1713_s0 }
   0x2   :  { %8 = vsyncpa [#allocation3], 0 }
   0x3   :  { %10 = vsyncpa [#allocation3 + $0x1], 0 }
   0x4   :  { %11 = vsyncpa [#allocation6], 0 }
   0x5   :  { %13 = vsyncpa [#allocation6 + $0x1], 0 }
   0x6   :  { %14 = vsyncpa [#allocation4], 0 }
   0x7   :  { %16 = vsyncpa [#allocation4 + $0x1], 0  ;;  %s1206_s12 = smov 0   ;;  %s1208_s13 = smov 0  }
   0x8   :  { %s1210_s14 = smov 0   ;;  %s1212_s15 = smov 0  }
   0x9   :  { %s1214_s16 = smov 0   ;;  %s1216_s17 = smov 0  }
   0xa   :  { %s1218_s18 = smov 0   ;;  %s1220_s19 = smov 0  }
   0xb LB: > { %1721 = sst [smem:[#allocation11_spill]] %s1176_s18  ;;  %s828_s20 = sadd.s32 4294967295, %s1180_s19   ;;  %s1180_s19 = sphi %s1220_s19, %s22_s19   ;;  %s1176_s18 = sphi %s1218_s18, %s1756_s18   ;;  %s1172_s17 = sphi %s1216_s17, %s1761_s17   ;;  %s1168_s16 = sphi %s1214_s16, %s1754_s16   ;;  %s1164_s15 = sphi %s1212_s15, %s1760_s15   ;;  %s1160_s14 = sphi %s1210_s14, %s1759_s14   ;;  %s1156_s13 = sphi %s1208_s13, %s1758_s13   ;;  %s1152_s12 = sphi %s1206_s12, %s1757_s12  }
   0xc   : > { %s829_s21 = sadd.s32 4294967294, %s1180_s19   ;;  %s31_s22 = sadd.s32 1, %s1172_s17 }
   0xd   : > { %s34_s23 = sadd.s32 1, %s1176_s18  ;;  %p32_p0 = scmp.ge.s32.totalorder %s31_s22, 2 }
   0xe   : > { %s43_s24 = sadd.s32 1, %s1160_s14  ;;  %p50_p1 = scmp.ne.s32.totalorder %s1160_s14, %s1156_s13 }
   0xf   : > { %p51_p2 = scmp.eq.s32.totalorder %s1180_s19, 0  ;;  %s1763_s22 = smov (%p32_p0, %s31_s22), 0 }
  0x10   : > { %1722 = sst [smem:[#allocation12_spill]] %s1763_s22  ;;  %s1765_s23 = smov (!%p32_p0, %s34_s23), %s1176_s18 }
  0x11   : > { %s39_s25 = ssub.s32 %s1172_s17, %s1763_s22  ;;  %p1259_p3 = por %p51_p2, %p50_p1 }
  0x12   : > { %p36_p4 = scmp.ge.s32.totalorder %s1765_s23, 2  ;;  %p56_p5 = scmp.ne.s32.totalorder %s1156_s13, %s1152_s12 }
  0x13   : > { %p57_p6 = scmp.eq.s32.totalorder %s828_s20, 0  ;;  %p131_p7 = scmp.eq.s32.totalorder %s828_s20, 3 }
  0x14   : > { %s1767_s23 = smov (%p36_p4, %s1765_s23), 0  ;;  %p137_p10 = scmp.eq.s32.totalorder %s829_s21, 3 }
  0x15   : > { %1724 = sst [smem:[#allocation13_spill]] %s1767_s23  ;;  %p1267_p8 = por %p57_p6, %p56_p5 }
  0x16   : > { %p1271_p9 = por %p131_p7, %p50_p1  ;;  %s38_s29 = ssub.s32 %s1176_s18, %s1767_s23 }
  0x17   : > { %s40_s30 = sor.u32 %s39_s25, %s38_s29  ;;  %p1277_p12 = por %p137_p10, %p56_p5 }
  0x18   : > { %p41_p11 = scmp.eq.s32.totalorder %s40_s30, 0  ;;  %p883_p13 = scmp.lt.s32.totalorder %s1180_s19, 4 }
  0x19   : > { %s1283_s5 = sand.u32 1, %s1160_s14   ;;  %s833_s8 = sshll.u32 %s1172_s17, 4 }
  0x1a   : > { %s1286_s6 = scalar_select %p41_p11, %s1160_s14, %s43_s24  }
  0x1b   : > { %s832_s7 = sshll.u32 %s1283_s5, 7  ;;  %s834_s9 = sshll.u32 %s1176_s18, 5 }
  0x1c   : > { %s164_s10 = scalar_lea.vmem [#allocation2], %s832_s7  ;;  %s169_s20 = sadd.s32 %s834_s9, %s833_s8 }
  0x1d   : > { %s174_s11 = sshll.u32 %s164_s10, 4  ;;  %s835_s21 = sshll.u32 %s169_s20, 3  ;;  %s175_s11 = int_to_ptr.vmem [resolvable:$true] %s174_s11 }
  0x1e   : > { %p1293_p0 = pnand %p883_p13, %p1259_p3  ;;  %s1729_s0 = sld [smem:[#allocation14_spill]] }
  0x1f   : > { %s161_s22 = scalar_lea.sflag [#allocation3], %s1283_s5  ;;  %s1182_s18 = smov 128  }
  0x20   : > { %s1183_s10 = smov 8   ;;  %p840_p1 = scmp.ge.s32.totalorder %s1180_s19, 1 }
  0x21   : > { %p206_p2 = scmp.lt.s32.totalorder %s1180_s19, 5  ;;  %s195_s9 = scalar_lea.hbm %s1714_s1, %s835_s21 }
  0x22   : > { %s196_s20 = sshll.u32 %s195_s9, 4  ;;  %s188_s29 = scalar_lea.vmem [#allocation5], %s832_s7  ;;  %s197_s20 = int_to_ptr.hbm [resolvable:$true] %s196_s20 }
  0x23   : > { %p207_p3 = pnand %p840_p1, %p206_p2  ;;  %s198_s30 = sshll.u32 %s188_s29, 4  ;;  %s199_s30 = int_to_ptr.vmem [resolvable:$true] %s198_s30 }
  0x24   : > { %s171_s24 = scalar_lea.hbm %s1729_s0, %s835_s21  ;;  %s1312_s0 = sand.u32 (!%p207_p3), 1, %s1156_s13  }
  0x25   : > { %s172_s23 = sshll.u32 %s171_s24, 4  ;;  %s185_s24 = scalar_lea.sflag [#allocation6], %s1283_s5  ;;  %s173_s23 = int_to_ptr.hbm [resolvable:$true] %s172_s23 }
  0x26   : > { %875 = dma.hbm_to_vmem [thread:$0]  (!%p1293_p0), %s173_s23, 2048, %s175_s11, %s161_s22, %s1182_s18, %s1182_s18, %s1183_s10  }
  0x27   : > { %878 = dma.hbm_to_vmem [thread:$0]  (!%p1293_p0), %s197_s20, 2048, %s199_s30, %s185_s24, %s1182_s18, %s1182_s18, %s1183_s10  }
  0x28   : > { %210 = sbr.rel (%p207_p3) target bundleno = 264 (0x108), region = 32  ;;  %s1315_s22 = sshll.u32 (!%p207_p3), %s1312_s0, 7 }
  0x29   : > { %s213_s23 = scalar_lea.sflag (!%p207_p3), [#allocation3], %s1312_s0  ;;  %s1319_s11 = scalar_lea.vmem (!%p207_p3), [#allocation2], %s1315_s22 }
  0x2d   : > { %1139 = dma.done.wait (%p1267_p8), %s213_s23, 2048  }
  0x2e   : > { %1141 = vsyncadd (%p1267_p8), %s213_s23, 4294965248  ;;  %s223_s18 = scalar_lea.sflag [#allocation6], %s1312_s0  ;;  %s1327_s5 = scalar_lea.vmem [#allocation5], %s1315_s22 }
  0x2f   : > { %1143 = dma.done.wait (%p1267_p8), %s223_s18, 2048  }
  0x30   : > { %1145 = vsyncadd (%p1267_p8), %s223_s18, 4294965248  ;;  %v1334_v0 = vld [vmem:[%s1319_s11 + $0x20] sm:$0xff]  ;;  %v1340_v2 = vld [vmem:[%s1319_s11 + $0x10] sm:$0xff]  ;;  %s1469_s27 = scalar_lea.vmem [#allocation7], %s1315_s22  ;;  %s861_s25 = sshll.u32 %s1164_s15, 4 }
  0x31   : > { %v953_v1 = vld [vmem:[%s1715_s2] ss:$0 sm:$0xff]  ;;  %v1349_v7 = vld [vmem:[%s1319_s11 + $0x28] sm:$0xff]  ;;  %v1352_v8 = vld [vmem:[%s1319_s11 + $0x18] sm:$0xff]  ;;  %s862_s10 = sshll.u32 %s1168_s16, 5  ;;  %s709_s20 = sshll.u32 %s1469_s27, 4  ;;  %s710_s20 = int_to_ptr.vmem [resolvable:$true] %s709_s20 }
  0x32   : > { %v1343_v3 = vld [vmem:[%s1319_s11] sm:$0xff]  ;;  %v298_v4 = vmul.f32 %v953_v1, %v1334_v0  ;;  %v296_v5 = vmul.f32 %v953_v1, %v1340_v2  ;;  %v1355_v9 = vld [vmem:[%s1319_s11 + $0x8] sm:$0xff]  ;;  %v299_v10 = vmul.f32 %v953_v1, %v1349_v7  ;;  %v297_v11 = vmul.f32 %v953_v1, %v1352_v8  ;;  %v1364_v14 = vld [vmem:[%s1319_s11 + $0x38] sm:$0xff]  ;;  %s706_s15 = sadd.s32 %s862_s10, %s861_s25  ;;  %s695_s30 = scalar_lea.sflag [#allocation4], %s1312_s0 }
  0x33   : > { %v294_v6 = vmul.f32 %v953_v1, %v1343_v3  ;;  %v295_v12 = vmul.f32 %v953_v1, %v1355_v9  ;;  %v1361_v13 = vld [vmem:[%s1319_s11 + $0x40] sm:$0xff]  ;;  %v1367_v15 = vld [vmem:[%s1319_s11 + $0x30] sm:$0xff]  ;;  %v301_v17 = vmul.f32 %v953_v1, %v1364_v14  ;;  %v1373_v19 = vld [vmem:[%s1319_s11 + $0x58] sm:$0xff]  ;;  %s863_s16 = sshll.u32 %s706_s15, 3  ;;  %s1098_s18 = scalar_lea.hbm %s1716_s3, 512 }
  0x34   : > { %318 = vadd.xlane.f32.xlu2 %v298_v4  ;;  %314 = vadd.xlane.f32.xlu1 %v296_v5  ;;  %v302_v16 = vmul.f32 %v953_v1, %v1361_v13  ;;  %v300_v18 = vmul.f32 %v953_v1, %v1367_v15  ;;  %v1376_v20 = vld [vmem:[%s1319_s11 + $0x50] sm:$0xff]  ;;  %v1379_v21 = vld [vmem:[%s1319_s11 + $0x48] sm:$0xff]  ;;  %v305_v22 = vmul.f32 %v953_v1, %v1373_v19  ;;  %v1391_v27 = vld [vmem:[%s1319_s11 + $0x60] sm:$0xff]  ;;  %s708_s9 = scalar_lea.hbm %s1716_s3, %s863_s16 }
  0x35   : > { %310 = vadd.xlane.f32.xlu0 %v294_v6  ;;  %v304_v23 = vmul.f32 %v953_v1, %v1376_v20  ;;  %v303_v24 = vmul.f32 %v953_v1, %v1379_v21  ;;  %v1385_v25 = vld [vmem:[%s1319_s11 + $0x70] sm:$0xff]  ;;  %v1388_v26 = vld [vmem:[%s1319_s11 + $0x68] sm:$0xff]  ;;  %v306_v30 = vmul.f32 %v953_v1, %v1391_v27  ;;  %v1397_v31 = vld [vmem:[%s1319_s11 + $0x78] sm:$0xff]  ;;  %s711_s29 = sshll.u32 %s708_s9, 4  ;;  %s712_s29 = int_to_ptr.hbm [resolvable:$true] %s711_s29 }
  0x36   : > { %v308_v28 = vmul.f32 %v953_v1, %v1385_v25  ;;  %v307_v29 = vmul.f32 %v953_v1, %v1388_v26  ;;  %v309_v32 = vmul.f32 %v953_v1, %v1397_v31  ;;  %s1092_s24 = sshra.s32 %s712_s29, 4  ;;  %s1093_s24 = int_to_ptr.hbm [resolvable:$true] %s1092_s24 }
  0x37   : > { %s1094_s22 = scalar_lea.hbm %s1093_s24, 128  ;;  %p1099_p7 = scmp.lt.s32.totalorder %s1093_s24, %s1716_s3 }
  0x38   : > { %p1095_p4 = scmp.ne.s32.totalorder %s1093_s24, %s1094_s22  ;;  %p1100_p8 = scmp.lt.s32.totalorder %s1098_s18, %s1094_s22 }
  0x3a   : > { %p1096_p5 = pnand %p1095_p4, %p1271_p9  ;;  %p1101_p10 = por %p1100_p8, %p1099_p7 }
  0x3c   : > { %320 = vadd.xlane.f32.xlu2 %v299_v10  ;;  %316 = vadd.xlane.f32.xlu1 %v297_v11  ;;  %p1097_p6 = pneg %p1096_p5 }
  0x3d   : > { %312 = vadd.xlane.f32.xlu0 %v295_v12 }
  0x3e   : > { %p1102_p11 = pnand %p1101_p10, %p1097_p6 }
  0x44   : > { %326 = vadd.xlane.f32.xlu2 %v302_v16  ;;  %324 = vadd.xlane.f32.xlu1 %v301_v17 }
  0x45   : > { %322 = vadd.xlane.f32.xlu0 %v300_v18 }
  0x4c   : > { %332 = vadd.xlane.f32.xlu2 %v305_v22  ;;  %330 = vadd.xlane.f32.xlu1 %v304_v23 }
  0x4d   : > { %328 = vadd.xlane.f32.xlu0 %v303_v24 }
  0x54   : > { %338 = vadd.xlane.f32.xlu2 %v308_v28  ;;  %336 = vadd.xlane.f32.xlu1 %v307_v29 }
  0x55   : > { %334 = vadd.xlane.f32.xlu0 %v306_v30 }
  0x5d   : > { %340 = vadd.xlane.f32.xlu0 %v309_v32 }
  0xa7   : > { %v319_v33 = vpop.xlane.xlu2 %318  ;;  %v315_v34 = vpop.xlane.xlu1 %314 }
  0xa8   : > { %v848_v35 = vmul.f32 -1.442695, %v319_v33  ;;  %v846_v36 = vmul.f32 -1.442695, %v315_v34  ;;  %v311_v37 = vpop.xlane.xlu0 %310 }
  0xa9   : > { %v844_v38 = vmul.f32 -1.442695, %v311_v37 }
  0xaa   : > { %954 = vpow2.f32 %v848_v35 }
  0xab   : > { %956 = vpow2.f32 %v846_v36 }
  0xac   : > { %958 = vpow2.f32 %v844_v38 }
  0xaf   : > { %v321_v39 = vpop.xlane.xlu2 %320  ;;  %v317_v40 = vpop.xlane.xlu1 %316 }
  0xb0   : > { %v955_v41 = vpop.eup %954  ;;  %v849_v42 = vmul.f32 -1.442695, %v321_v39  ;;  %v313_v43 = vpop.xlane.xlu0 %312  ;;  %v847_v46 = vmul.f32 -1.442695, %v317_v40 }
  0xb1   : > { %v957_v44 = vpop.eup %956  ;;  %v394_v45 = vadd.f32 1.0, %v955_v41  ;;  %v845_v49 = vmul.f32 -1.442695, %v313_v43  ;;  %v278_v41 = vld [vmem:[%s1327_s5 + $0x20] sm:$0xff] }
  0xb2   : > { %v959_v47 = vpop.eup %958  ;;  %v1400_v48 = vadd.f32 1.0, %v957_v44  ;;  %960 = vpow2.f32 %v849_v42 }
  0xb3   : > { %962 = vrcp.f32 %v394_v45  ;;  %v1403_v50 = vadd.f32 1.0, %v959_v47  ;;  %v475_v51 = vand.u32 2147483647, %v394_v45  ;;  %v477_v52 = vand.u32 2147483648, %v394_v45  ;;  %v276_v47 = vld [vmem:[%s1327_s5 + $0x10] sm:$0xff] }
  0xb4   : > { %964 = vrcp.f32 %v1400_v48  ;;  %v445_v53 = vand.u32 2147483647, %v1400_v48  ;;  %vm471_vm0 = vweird.f32 %v394_v45  ;;  %vm441_vm1 = vweird.f32 %v1400_v48 }
  0xb5   : > { %966 = vpow2.f32 %v847_v46  ;;  %v447_v58 = vand.u32 2147483648, %v1400_v48  ;;  %vm1411_vm2 = vcmp.eq.f32.partialorder %v475_v51, 8.507059e+37  ;;  %v478_v1 = vor.u32 1.1754944e-38, %v477_v52 }
  0xb6   : > { %968 = vpow2.f32 %v845_v49  ;;  %v415_v4 = vand.u32 2147483647, %v1403_v50  ;;  %vm1417_vm3 = vcmp.eq.f32.partialorder %v445_v53, 8.507059e+37  ;;  %v417_v12 = vand.u32 2147483648, %v1403_v50  ;;  %v275_v53 = vld [vmem:[%s1327_s5 + $0x8] sm:$0xff] }
  0xb7   : > { %970 = vrcp.f32 %v1403_v50  ;;  %v327_v54 = vpop.xlane.xlu2 %326  ;;  %v325_v60 = vpop.xlane.xlu1 %324  ;;  %v448_v28 = vor.u32 1.1754944e-38, %v447_v58  ;;  %vm411_vm4 = vweird.f32 %v1403_v50 }
  0xb8   : > { %v961_v55 = vpop.eup %960  ;;  %v852_v56 = vmul.f32 -1.442695, %v327_v54  ;;  %v323_v5 = vpop.xlane.xlu0 %322  ;;  %v851_v22 = vmul.f32 -1.442695, %v325_v60  ;;  %vm1429_vm7 = vcmp.eq.f32.partialorder %v415_v4, 8.507059e+37  ;;  %v418_v39 = vor.u32 1.1754944e-38, %v417_v12 }
  0xb9   : > { %v963_v57 = vpop.eup %962  ;;  %v1409_v59 = vadd.f32 1.0, %v961_v55  ;;  %v850_v43 = vmul.f32 -1.442695, %v323_v5  ;;  %v274_v4 = vld [vmem:[%s1327_s5] sm:$0xff] }
  0xba   : > { %v965_v61 = vpop.eup %964  ;;  %v467_v62 = vmul.f32 %v963_v57, %v394_v45  ;;  %vm472_vm5 = vweird.f32 %v963_v57 }
  0xbb   : > { %v967_v6 = vpop.eup %966  ;;  %v437_v10 = vmul.f32 %v965_v61, %v1400_v48  ;;  %972 = vrcp.f32 %v1409_v59  ;;  %vm442_vm6 = vweird.f32 %v965_v61  ;;  %v490_v35 = vand.u32 2147483647, %v1409_v59  ;;  %vm473_vm8 = vmor %vm471_vm0, %vm472_vm5 }
  0xbc   : > { %v969_v16 = vpop.eup %968  ;;  %v468_v17 = vsub.f32 1.0, %v467_v62  ;;  %v1423_v18 = vadd.f32 1.0, %v967_v6  ;;  %974 = vpow2.f32 %v852_v56  ;;  %v492_v36 = vand.u32 2147483648, %v1409_v59  ;;  %vm443_vm10 = vmor %vm441_vm1, %vm442_vm6 }
  0xbd   : > { %v971_v23 = vpop.eup %970  ;;  %v438_v24 = vsub.f32 1.0, %v437_v10  ;;  %v1426_v29 = vadd.f32 1.0, %v969_v16  ;;  %vm486_vm9 = vweird.f32 %v1409_v59  ;;  %vm1447_vm12 = vcmp.eq.f32.partialorder %v490_v35, 8.507059e+37 }
  0xbe   : > { %v469_v30 = vmul.f32 %v963_v57, %v468_v17  ;;  %v407_v32 = vmul.f32 %v971_v23, %v1403_v50  ;;  %976 = vrcp.f32 %v1423_v18  ;;  %vm412_vm11 = vweird.f32 %v971_v23 }
  0xbf   : > { %v439_v34 = vmul.f32 %v965_v61, %v438_v24  ;;  %978 = vpow2.f32 %v851_v22  ;;  %v493_v54 = vor.u32 1.1754944e-38, %v492_v36  ;;  %vm413_vm13 = vmor %vm411_vm4, %vm412_vm11  ;;  %vm456_vm15 = vweird.f32 %v1423_v18  ;;  %v333_v11 = vpop.xlane.xlu2 %332  ;;  %v331_v24 = vpop.xlane.xlu1 %330 }
  0xc0   : > { %v470_v37 = vadd.f32 %v963_v57, %v469_v30  ;;  %v408_v38 = vsub.f32 1.0, %v407_v32  ;;  %980 = vrcp.f32 %v1426_v29  ;;  %v1453_v58 = vpop.xlane.xlu0 %328  ;;  %v460_v17 = vand.u32 2147483647, %v1423_v18 }
  0xc1   : > { %v973_v40 = vpop.eup %972  ;;  %v440_v42 = vadd.f32 %v965_v61, %v439_v34  ;;  %v462_v22 = vand.u32 2147483648, %v1423_v18  ;;  %v430_v32 = vand.u32 2147483647, %v1426_v29  ;;  %v432_v33 = vand.u32 2147483648, %v1426_v29 }
  0xc2   : > { %v975_v44 = vpop.eup %974  ;;  %v474_v46 = vsel %vm473_vm8, %v963_v57, %v470_v37  ;;  %v409_v49 = vmul.f32 %v971_v23, %v408_v38  ;;  %v482_v51 = vmul.f32 %v973_v40, %v1409_v59  ;;  %vm487_vm14 = vweird.f32 %v973_v40 }
  0xc3   : > { %v479_v45 = vsel %vm1411_vm2, %v478_v1, %v474_v46  ;;  %v444_v52 = vsel %vm443_vm10, %v965_v61, %v440_v42  ;;  %v1459_v61 = vadd.f32 1.0, %v975_v44  ;;  %vm488_vm0 = vmor %vm486_vm9, %vm487_vm14  ;;  %vm426_vm2 = vweird.f32 %v1426_v29  ;;  %v277_v44 = vld [vmem:[%s1327_s5 + $0x18] sm:$0xff] }
  0xc4   : > { %v650_v55 = vmul.f32 %v479_v45, %v278_v41  ;;  %v449_v56 = vsel %vm1417_vm3, %v448_v28, %v444_v52  ;;  %v410_v48 = vadd.f32 %v971_v23, %v409_v49  ;;  %v483_v57 = vsub.f32 1.0, %v482_v51  ;;  %v977_v60 = vpop.eup %976 }
  0xc5   : > { %v648_v62 = vmul.f32 %v449_v56, %v276_v47  ;;  %v979_v63 = vpop.eup %978  ;;  %v452_v10 = vmul.f32 %v977_v60, %v1423_v18  ;;  %vm457_vm1 = vweird.f32 %v977_v60  ;;  %982 = vrcp.f32 %v1459_v61 }
  0xc6   : > { %v666_v1 = vadd.f32 %v650_v55, %v1334_v0  ;;  %v414_v5 = vsel %vm413_vm13, %v971_v23, %v410_v48  ;;  %v484_v6 = vmul.f32 %v973_v40, %v483_v57  ;;  %v981_v12 = vpop.eup %980  ;;  %v1485_v59 = vadd.f32 1.0, %v979_v63  ;;  %vm458_vm4 = vmor %vm456_vm15, %vm457_vm1 }
  0xc7   : > { %v664_v16 = vadd.f32 %v648_v62, %v1340_v2  ;;  %v419_v50 = vsel %vm1429_vm7, %v418_v39, %v414_v5  ;;  %v453_v28 = vsub.f32 1.0, %v452_v10  ;;  %v422_v30 = vmul.f32 %v981_v12, %v1426_v29  ;;  %v279_v2 = vld [vmem:[%s1327_s5 + $0x28] sm:$0xff]  ;;  %v339_v57 = vpop.xlane.xlu2 %338 }
  0xc8   : > { %682 = vst [vmem:[%s1469_s27 + $0x20] sm:$0xff] %v666_v1  ;;  %v646_v0 = vmul.f32 %v419_v50, %v274_v4  ;;  %v485_v23 = vadd.f32 %v973_v40, %v484_v6  ;;  %vm427_vm3 = vweird.f32 %v981_v12  ;;  %984 = vpow2.f32 %v850_v43  ;;  %v335_v43 = vpop.xlane.xlu0 %334  ;;  %v337_v4 = vpop.xlane.xlu1 %336 }
  0xc9   : > { %680 = vst [vmem:[%s1469_s27 + $0x10] sm:$0xff] %v664_v16  ;;  %v454_v36 = vmul.f32 %v977_v60, %v453_v28  ;;  %v423_v37 = vsub.f32 1.0, %v422_v30  ;;  %vm461_vm5 = vcmp.eq.f32.partialorder %v460_v17, 8.507059e+37  ;;  %vm1492_vm6 = vcmp.eq.f32.partialorder %v430_v32, 8.507059e+37  ;;  %vm428_vm7 = vmor %vm426_vm2, %vm427_vm3 }
  0xca   : > { %v662_v34 = vadd.f32 %v646_v0, %v1343_v3  ;;  %v489_v35 = vsel %vm488_vm0, %v973_v40, %v485_v23  ;;  %v463_v3 = vor.u32 1.1754944e-38, %v462_v22  ;;  %986 = vrcp.f32 %v1485_v59  ;;  %v281_v40 = vld [vmem:[%s1327_s5 + $0x38] sm:$0xff] }
  0xcb   : > { %v494_v38 = vsel %vm1447_vm12, %v493_v54, %v489_v35  ;;  %v455_v41 = vadd.f32 %v977_v60, %v454_v36  ;;  %v424_v42 = vmul.f32 %v981_v12, %v423_v37  ;;  %v433_v51 = vor.u32 1.1754944e-38, %v432_v33  ;;  %v983_v45 = vpop.eup %982 }
  0xcc   : > { %678 = vst [vmem:[%s1469_s27] sm:$0xff] %v662_v34  ;;  %v651_v39 = vmul.f32 %v494_v38, %v279_v2  ;;  %vm531_vm8 = vweird.f32 %v1459_v61  ;;  %v855_v18 = vmul.f32 -1.442695, %v333_v11  ;;  %v854_v54 = vmul.f32 -1.442695, %v331_v24 }
  0xcd   : > { %v459_v47 = vsel %vm458_vm4, %v977_v60, %v455_v41  ;;  %v425_v49 = vadd.f32 %v981_v12, %v424_v42  ;;  %v535_v48 = vand.u32 2147483647, %v1459_v61  ;;  %v537_v62 = vand.u32 2147483648, %v1459_v61 }
  0xce   : > { %v667_v46 = vadd.f32 %v651_v39, %v1349_v7  ;;  %v464_v52 = vsel %vm461_vm5, %v463_v3, %v459_v47  ;;  %v527_v7 = vmul.f32 %v983_v45, %v1459_v61  ;;  %988 = vpow2.f32 %v855_v18  ;;  %v985_v63 = vpop.eup %984 }
  0xcf   : > { %v649_v55 = vmul.f32 %v464_v52, %v277_v44  ;;  %v429_v56 = vsel %vm428_vm7, %v981_v12, %v425_v49  ;;  %v853_v29 = vmul.f32 -1.442695, %v1453_v58  ;;  %990 = vpow2.f32 %v854_v54 }
  0xd0   : > { %683 = vst [vmem:[%s1469_s27 + $0x28] sm:$0xff] %v667_v46  ;;  %v434_v60 = vsel %vm1492_vm6, %v433_v51, %v429_v56  ;;  %v528_v6 = vsub.f32 1.0, %v527_v7  ;;  %v987_v10 = vpop.eup %986  ;;  %vm532_vm9 = vweird.f32 %v983_v45  ;;  %v1511_v11 = vadd.f32 1.0, %v985_v63  ;;  %v341_v37 = vpop.xlane.xlu0 %340 }
  0xd1   : > { %v665_v1 = vadd.f32 %v649_v55, %v1352_v8  ;;  %v647_v5 = vmul.f32 %v434_v60, %v275_v53  ;;  %992 = vpow2.f32 %v853_v29  ;;  %v858_v12 = vmul.f32 -1.442695, %v339_v57  ;;  %vm533_vm12 = vmor %vm531_vm8, %vm532_vm9 }
  0xd2   : > { %v529_v50 = vmul.f32 %v983_v45, %v528_v6  ;;  %v512_v58 = vmul.f32 %v987_v10, %v1485_v59  ;;  %v857_v17 = vmul.f32 -1.442695, %v337_v4  ;;  %vm1516_vm10 = vcmp.eq.f32.partialorder %v535_v48, 8.507059e+37 }
  0xd3   : > { %681 = vst [vmem:[%s1469_s27 + $0x18] sm:$0xff] %v665_v1  ;;  %v663_v16 = vadd.f32 %v647_v5, %v1355_v9  ;;  %v538_v22 = vor.u32 1.1754944e-38, %v537_v62  ;;  %vm516_vm11 = vweird.f32 %v1485_v59  ;;  %994 = vrcp.f32 %v1511_v11  ;;  %v282_v9 = vld [vmem:[%s1327_s5 + $0x40] sm:$0xff] }
  0xd4   : > { %v530_v24 = vadd.f32 %v983_v45, %v529_v50  ;;  %v513_v0 = vsub.f32 1.0, %v512_v58  ;;  %996 = vpow2.f32 %v858_v12  ;;  %v856_v23 = vmul.f32 -1.442695, %v335_v43  ;;  %v989_v28 = vpop.eup %988  ;;  %v280_v50 = vld [vmem:[%s1327_s5 + $0x30] sm:$0xff] }
  0xd5   : > { %679 = vst [vmem:[%s1469_s27 + $0x8] sm:$0xff] %v663_v16  ;;  %vm517_vm13 = vweird.f32 %v987_v10  ;;  %v520_v30 = vand.u32 2147483647, %v1485_v59  ;;  %v522_v2 = vand.u32 2147483648, %v1485_v59  ;;  %v505_v32 = vand.u32 2147483647, %v1511_v11  ;;  %v991_v33 = vpop.eup %990 }
  0xd6   : > { %v534_v34 = vsel %vm533_vm12, %v983_v45, %v530_v24  ;;  %v514_v35 = vmul.f32 %v987_v10, %v513_v0  ;;  %v1530_v36 = vadd.f32 1.0, %v989_v28  ;;  %998 = vpow2.f32 %v857_v17  ;;  %vm518_vm14 = vmor %vm516_vm11, %vm517_vm13 }
  0xd7   : > { %v993_v38 = vpop.eup %992  ;;  %v539_v61 = vsel %vm1516_vm10, %v538_v22, %v534_v34  ;;  %v507_v39 = vand.u32 2147483648, %v1511_v11  ;;  %v1535_v41 = vadd.f32 1.0, %v991_v33  ;;  %1000 = vpow2.f32 %v856_v23 }
  0xd8   : > { %v654_v42 = vmul.f32 %v539_v61, %v282_v9  ;;  %v515_v44 = vadd.f32 %v987_v10, %v514_v35  ;;  %1002 = vrcp.f32 %v1530_v36  ;;  %vm521_vm15 = vcmp.eq.f32.partialorder %v520_v30, 8.507059e+37  ;;  %v285_v61 = vld [vmem:[%s1327_s5 + $0x58] sm:$0xff] }
  0xd9   : > { %v995_v3 = vpop.eup %994  ;;  %v523_v46 = vor.u32 1.1754944e-38, %v522_v2  ;;  %1004 = vrcp.f32 %v1535_v41  ;;  %v859_v47 = vmul.f32 -1.442695, %v341_v37  ;;  %vm501_vm0 = vweird.f32 %v1511_v11 }
  0xda   : > { %v997_v49 = vpop.eup %996  ;;  %v670_v51 = vadd.f32 %v654_v42, %v1361_v13  ;;  %v519_v43 = vsel %vm518_vm14, %v987_v10, %v515_v44  ;;  %v497_v45 = vmul.f32 %v995_v3, %v1511_v11  ;;  %vm1546_vm1 = vcmp.eq.f32.partialorder %v505_v32, 8.507059e+37 }
  0xdb   : > { %v524_v52 = vsel %vm521_vm15, %v523_v46, %v519_v43  ;;  %v508_v59 = vor.u32 1.1754944e-38, %v507_v39  ;;  %v580_v18 = vand.u32 2147483647, %v1530_v36  ;;  %v582_v7 = vand.u32 2147483648, %v1530_v36 }
  0xdc   : > { %v999_v54 = vpop.eup %998  ;;  %686 = vst [vmem:[%s1469_s27 + $0x40] sm:$0xff] %v670_v51  ;;  %v653_v55 = vmul.f32 %v524_v52, %v281_v40  ;;  %v498_v56 = vsub.f32 1.0, %v497_v45  ;;  %v1553_v13 = vadd.f32 1.0, %v993_v38  ;;  %vm576_vm2 = vweird.f32 %v1530_v36  ;;  %v284_v40 = vld [vmem:[%s1327_s5 + $0x50] sm:$0xff] }
  0xdd   : > { %v1001_v48 = vpop.eup %1000  ;;  %v565_v57 = vand.u32 2147483647, %v1535_v41  ;;  %v1557_v60 = vadd.f32 1.0, %v997_v49  ;;  %1006 = vpow2.f32 %v859_v47  ;;  %vm502_vm3 = vweird.f32 %v995_v3 }
  0xde   : > { %v1003_v62 = vpop.eup %1002  ;;  %v669_v29 = vadd.f32 %v653_v55, %v1364_v14  ;;  %v499_v4 = vmul.f32 %v995_v3, %v498_v56  ;;  %1008 = vrcp.f32 %v1553_v13  ;;  %vm1562_vm4 = vcmp.eq.f32.partialorder %v580_v18, 8.507059e+37  ;;  %vm503_vm6 = vmor %vm501_vm0, %vm502_vm3 }
  0xdf   : > { %v1005_v63 = vpop.eup %1004  ;;  %v572_v1 = vmul.f32 %v1003_v62, %v1530_v36  ;;  %vm561_vm5 = vweird.f32 %v1535_v41  ;;  %v1567_v6 = vadd.f32 1.0, %v999_v54  ;;  %v583_v12 = vor.u32 1.1754944e-38, %v582_v7 }
  0xe0   : > { %685 = vst [vmem:[%s1469_s27 + $0x38] sm:$0xff] %v669_v29  ;;  %v500_v10 = vadd.f32 %v995_v3, %v499_v4  ;;  %v557_v14 = vmul.f32 %v1005_v63, %v1535_v41  ;;  %v567_v16 = vand.u32 2147483648, %v1535_v41  ;;  %vm1575_vm7 = vcmp.eq.f32.partialorder %v565_v57, 8.507059e+37 }
  0xe1   : > { %v573_v58 = vsub.f32 1.0, %v572_v1  ;;  %v550_v8 = vand.u32 2147483647, %v1553_v13  ;;  %1010 = vrcp.f32 %v1557_v60  ;;  %vm577_vm8 = vweird.f32 %v1003_v62 }
  0xe2   : > { %v504_v22 = vsel %vm503_vm6, %v995_v3, %v500_v10  ;;  %v558_v24 = vsub.f32 1.0, %v557_v14  ;;  %v1581_v0 = vadd.f32 1.0, %v1001_v48  ;;  %v552_v9 = vand.u32 2147483648, %v1553_v13  ;;  %vm578_vm12 = vmor %vm576_vm2, %vm577_vm8  ;;  %v288_v14 = vld [vmem:[%s1327_s5 + $0x70] sm:$0xff] }
  0xe3   : > { %v1007_v23 = vpop.eup %1006  ;;  %v509_v11 = vsel %vm1546_vm1, %v508_v59, %v504_v22  ;;  %v574_v28 = vmul.f32 %v1003_v62, %v573_v58  ;;  %1012 = vrcp.f32 %v1567_v6  ;;  %vm562_vm9 = vweird.f32 %v1005_v63 }
  0xe4   : > { %v1009_v30 = vpop.eup %1008  ;;  %v652_v2 = vmul.f32 %v509_v11, %v280_v50  ;;  %v559_v32 = vmul.f32 %v1005_v63, %v558_v24  ;;  %v568_v33 = vor.u32 1.1754944e-38, %v567_v16  ;;  %vm546_vm10 = vweird.f32 %v1553_v13  ;;  %vm563_vm14 = vmor %vm561_vm5, %vm562_vm9 }
  0xe5   : > { %v575_v34 = vadd.f32 %v1003_v62, %v574_v28  ;;  %v542_v35 = vmul.f32 %v1009_v30, %v1553_v13  ;;  %vm1589_vm11 = vcmp.eq.f32.partialorder %v550_v8, 8.507059e+37  ;;  %vm621_vm13 = vweird.f32 %v1557_v60 }
  0xe6   : > { %v668_v38 = vadd.f32 %v652_v2, %v1367_v15  ;;  %v560_v39 = vadd.f32 %v1005_v63, %v559_v32  ;;  %v625_v42 = vand.u32 2147483647, %v1557_v60  ;;  %v553_v47 = vor.u32 1.1754944e-38, %v552_v9 }
  0xe7   : > { %v1011_v44 = vpop.eup %1010  ;;  %v579_v3 = vsel %vm578_vm12, %v1003_v62, %v575_v34  ;;  %v543_v46 = vsub.f32 1.0, %v542_v35  ;;  %1014 = vrcp.f32 %v1581_v0  ;;  %v627_v51 = vand.u32 2147483648, %v1557_v60  ;;  %v283_v62 = vld [vmem:[%s1327_s5 + $0x48] sm:$0xff]  ;;  %v286_v35 = vld [vmem:[%s1327_s5 + $0x60] sm:$0xff] }
  0xe8   : > { %684 = vst [vmem:[%s1469_s27 + $0x30] sm:$0xff] %v668_v38  ;;  %v584_v15 = vsel %vm1562_vm4, %v583_v12, %v579_v3  ;;  %v564_v36 = vsel %vm563_vm14, %v1005_v63, %v560_v39  ;;  %v617_v49 = vmul.f32 %v1011_v44, %v1557_v60  ;;  %vm547_vm15 = vweird.f32 %v1009_v30 }
  0xe9   : > { %v1013_v43 = vpop.eup %1012  ;;  %v657_v45 = vmul.f32 %v584_v15, %v285_v61  ;;  %v569_v41 = vsel %vm1575_vm7, %v568_v33, %v564_v36  ;;  %v544_v52 = vmul.f32 %v1009_v30, %v543_v46  ;;  %vm1612_vm0 = vcmp.eq.f32.partialorder %v625_v42, 8.507059e+37  ;;  %vm548_vm1 = vmor %vm546_vm10, %vm547_vm15 }
  0xea   : > { %v656_v53 = vmul.f32 %v569_v41, %v284_v40  ;;  %v618_v59 = vsub.f32 1.0, %v617_v49  ;;  %v602_v54 = vmul.f32 %v1013_v43, %v1567_v6  ;;  %v610_v7 = vand.u32 2147483647, %v1567_v6 }
  0xeb   : > { %v673_v55 = vadd.f32 %v657_v45, %v1373_v19  ;;  %v545_v56 = vadd.f32 %v1009_v30, %v544_v52  ;;  %v612_v48 = vand.u32 2147483648, %v1567_v6  ;;  %vm622_vm2 = vweird.f32 %v1011_v44 }
  0xec   : > { %v672_v57 = vadd.f32 %v656_v53, %v1376_v20  ;;  %v619_v29 = vmul.f32 %v1011_v44, %v618_v59  ;;  %v603_v4 = vsub.f32 1.0, %v602_v54  ;;  %vm606_vm3 = vweird.f32 %v1567_v6  ;;  %vm623_vm5 = vmor %vm621_vm13, %vm622_vm2 }
  0xed   : > { %v1015_v63 = vpop.eup %1014  ;;  %689 = vst [vmem:[%s1469_s27 + $0x58] sm:$0xff] %v673_v55  ;;  %v549_v1 = vsel %vm548_vm1, %v1009_v30, %v545_v56  ;;  %vm607_vm4 = vweird.f32 %v1013_v43  ;;  %v1626_v19 = vadd.f32 1.0, %v1007_v23  ;;  %v628_v16 = vor.u32 1.1754944e-38, %v627_v51  ;;  %v287_v23 = vld [vmem:[%s1327_s5 + $0x68] sm:$0xff] }
  0xee   : > { %688 = vst [vmem:[%s1469_s27 + $0x50] sm:$0xff] %v672_v57  ;;  %v554_v20 = vsel %vm1589_vm11, %v553_v47, %v549_v1  ;;  %v620_v5 = vadd.f32 %v1011_v44, %v619_v29  ;;  %v604_v13 = vmul.f32 %v1013_v43, %v603_v4  ;;  %v587_v10 = vmul.f32 %v1015_v63, %v1581_v0  ;;  %vm608_vm7 = vmor %vm606_vm3, %vm607_vm4  ;;  %v289_v47 = vld [vmem:[%s1327_s5 + $0x78] sm:$0xff] }
  0xef   : > { %v655_v12 = vmul.f32 %v554_v20, %v283_v62  ;;  %vm1636_vm6 = vcmp.eq.f32.partialorder %v610_v7, 8.507059e+37  ;;  %1016 = vrcp.f32 %v1626_v19  ;;  %v613_v8 = vor.u32 1.1754944e-38, %v612_v48 }
  0xf0   : > { %v624_v58 = vsel %vm623_vm5, %v1011_v44, %v620_v5  ;;  %v605_v17 = vadd.f32 %v1013_v43, %v604_v13  ;;  %v588_v22 = vsub.f32 1.0, %v587_v10  ;;  %v595_v11 = vand.u32 2147483647, %v1581_v0 }
  0xf1   : > { %v671_v24 = vadd.f32 %v655_v12, %v1379_v21  ;;  %v629_v60 = vsel %vm1612_vm0, %v628_v16, %v624_v58  ;;  %v597_v28 = vand.u32 2147483648, %v1581_v0  ;;  %vm592_vm8 = vweird.f32 %v1015_v63 }
  0xf2   : > { %v660_v9 = vmul.f32 %v629_v60, %v288_v14  ;;  %v609_v30 = vsel %vm608_vm7, %v1013_v43, %v605_v17  ;;  %v589_v2 = vmul.f32 %v1015_v63, %v588_v22  ;;  %vm591_vm9 = vweird.f32 %v1581_v0 }
  0xf3   : > { %687 = vst [vmem:[%s1469_s27 + $0x48] sm:$0xff] %v671_v24  ;;  %v614_v21 = vsel %vm1636_vm6, %v613_v8, %v609_v30  ;;  %vm593_vm10 = vmor %vm591_vm9, %vm592_vm8  ;;  %v598_v37 = vor.u32 1.1754944e-38, %v597_v28  ;;  %vm596_vm11 = vcmp.eq.f32.partialorder %v595_v11, 8.507059e+37  ;;  %v642_v0 = vand.u32 2147483648, %v1626_v19 }
  0xf4   : > { %v676_v6 = vadd.f32 %v660_v9, %v1385_v25  ;;  %v659_v32 = vmul.f32 %v614_v21, %v287_v23  ;;  %v590_v33 = vadd.f32 %v1015_v63, %v589_v2  ;;  %vm636_vm13 = vweird.f32 %v1626_v19 }
  0xf5   : > { %v1017_v34 = vpop.eup %1016  ;;  %v643_v15 = vor.u32 1.1754944e-38, %v642_v0 }
  0xf6   : > { %692 = vst [vmem:[%s1469_s27 + $0x70] sm:$0xff] %v676_v6  ;;  %v675_v38 = vadd.f32 %v659_v32, %v1388_v26  ;;  %v594_v61 = vsel %vm593_vm10, %v1015_v63, %v590_v33  ;;  %v632_v39 = vmul.f32 %v1017_v34, %v1626_v19  ;;  %vm637_vm12 = vweird.f32 %v1017_v34 }
  0xf7   : > { %v599_v42 = vsel %vm596_vm11, %v598_v37, %v594_v61  ;;  %v640_v26 = vand.u32 2147483647, %v1626_v19  ;;  %vm638_vm14 = vmor %vm636_vm13, %vm637_vm12 }
  0xf8   : > { %691 = vst [vmem:[%s1469_s27 + $0x68] sm:$0xff] %v675_v38  ;;  %v658_v25 = vmul.f32 %v599_v42, %v286_v35  ;;  %v633_v44 = vsub.f32 1.0, %v632_v39 }
  0xf9   : > { %vm641_vm15 = vcmp.eq.f32.partialorder %v640_v26, 8.507059e+37 }
  0xfa   : > { %v674_v3 = vadd.f32 %v658_v25, %v1391_v27  ;;  %v634_v40 = vmul.f32 %v1017_v34, %v633_v44 }
  0xfc   : > { %690 = vst [vmem:[%s1469_s27 + $0x60] sm:$0xff] %v674_v3  ;;  %v635_v46 = vadd.f32 %v1017_v34, %v634_v40 }
  0xfe   : > { %v639_v36 = vsel %vm638_vm14, %v1017_v34, %v635_v46 }
  0xff   : > { %v644_v27 = vsel %vm641_vm15, %v643_v15, %v639_v36 }
 0x100   : > { %v661_v49 = vmul.f32 %v644_v27, %v289_v47 }
 0x102   : > { %v677_v51 = vadd.f32 %v661_v49, %v1397_v31 }
 0x104   : > { %693 = vst [vmem:[%s1469_s27 + $0x78] sm:$0xff] %v677_v51 }
 0x105   : > { %1105 = shalt.err (!%p1102_p11)
}
 0x106   : > { %s1184_s0 = smov 128   ;;  %s1185_s21 = smov 8  }
 0x107   : > { %870 = dma.vmem_to_hbm [thread:$0]  (%p1271_p9), %s710_s20, 2048, %s712_s29, %s695_s30, %s1184_s0, %s1184_s0, %s1185_s21  }
 0x108 PF: > { %p884_p13 = scmp.ge.s32.totalorder %s1180_s19, 2  ;;  %s726_s27 = sand.u32 1, %s1152_s12  }
 0x109   : > { %s727_s25 = scalar_lea.sflag [#allocation4], %s726_s27 }
 0x10a   : > { %p880_p0 = pnand %p884_p13, %p1277_p12 }
 0x10c   : > { %p881_p1 = pneg %p880_p0 }
 0x10e   : > { %1147 = dma.done.wait (%p881_p1), %s727_s25, 2048  }
 0x10f   : > { %1149 = vsyncadd (%p881_p1), %s727_s25, 4294965248  ;;  %s22_s19 = sadd.s32 1, %s1180_s19   ;;  %s1754_s16 = sld [smem:[#allocation11_spill]] }
 0x110   : > { %p19_p2 = scmp.ge.s32.totalorder %s22_s19, 6   ;;  %s1755_s28 = sld [smem:[#allocation12_spill]] }
 0x111   : > { %s1756_s18 = sld [smem:[#allocation13_spill]]  ;;  %s1757_s12 = smov %s1156_s13 }
 0x112   : > { %s1758_s13 = smov %s1160_s14  ;;  %s1759_s14 = smov %s1286_s6 }
 0x113   : > { %s1760_s15 = smov %s1172_s17  ;;  %21 = sbr.rel (!%p19_p2) target bundleno = 11 (0xb), region = 90 }
 0x116   : > { %s1761_s17 = smov %s1755_s28 }
 0x118   :  { %733 = vsyncpa [#allocation3], 1 }
 0x119   :  { %735 = vsyncpa [#allocation3 + $0x1], 1 }
 0x11a   :  { %736 = vsyncpa [#allocation6], 1 }
 0x11b   :  { %738 = vsyncpa [#allocation6 + $0x1], 1 }
 0x11c   :  { %739 = vsyncpa [#allocation4], 1 }
 0x11d   :  { %741 = vsyncpa [#allocation4 + $0x1], 1 }

</bundles_post_ra>
